<compile_context>
chip_gen: v7x
topology: tpu7x:2x2x1
jax: 0.10.0
libtpu: 0.0.40
codegen_flags: <defaults>
</compile_context>

<pallas_src>
import functools

import jax
import jax.numpy as jnp
from jax.experimental import pallas as pl
from jax.experimental.pallas import tpu as pltpu

CODE_SIZE = 128
NUM_HIDDEN_LAYERS = 2
NUM_LAYERS = NUM_HIDDEN_LAYERS + 1  # hidden_1, hidden_2, output
BN_EPS = 1e-5


def _batch_sums(h, hh):
    """Per-feature sums over the batch axis of h and h*h.

    For batch sizes that are a multiple of 8 (and > 8), restructure as
    (B//8, 8, C): the leading-axis sum is plain VPU vreg adds and only the
    final (8, C) -> (1, C) step is an XLU sublane reduce.
    """
    B, C = h.shape
    if B > 8 and B % 8 == 0:
        s = jnp.sum(h.reshape(B // 8, 8, C), axis=0)      # VPU adds
        ss = jnp.sum(hh.reshape(B // 8, 8, C), axis=0)     # VPU adds
        s = jnp.sum(s, axis=0, keepdims=True)               # one XLU reduce
        ss = jnp.sum(ss, axis=0, keepdims=True)              # one XLU reduce
    else:
        s = jnp.sum(h, axis=0, keepdims=True)
        ss = jnp.sum(hh, axis=0, keepdims=True)
    return s, ss


def generator_kernel(x_ref, w_ref, gamma_ref, beta_ref, o_ref):
    """Whole forward pass in one kernel invocation (no grid).

    x_ref:     (B, C)    float   noise / running activations
    w_ref:     (L, C, C) bf16    linear weights laid out so h = x @ W[l]
    gamma_ref: (L, C)    f32     batch-norm scale
    beta_ref:  (L, C)    f32     batch-norm shift
    o_ref:     (B, C)    f32     output
    """
    x = x_ref[...].astype(jnp.float32)
    B = x.shape[0]
    inv_b = 1.0 / float(B)
    num_layers = w_ref.shape[0]

    # Hoist the small (L, C) affine params out of the layer loop.
    gammas = gamma_ref[...].astype(jnp.float32)  # (L, C)
    betas = beta_ref[...].astype(jnp.float32)    # (L, C)

    # Static (unrolled) loop over the 3 residual blocks — layers are serial.
    for l in range(num_layers):
        # Linear (no bias): bf16 operands, f32 accumulation on the MXU.
        h = jnp.dot(x.astype(jnp.bfloat16), w_ref[l],
                    preferred_element_type=jnp.float32)

        # BatchNorm1d (training mode): per-feature batch statistics, biased
        # variance, eps = 1e-5, affine folded into scale/shift.
        s, ss = _batch_sums(h, h * h)
        mean = s * inv_b                                   # (1, C)
        var = ss * inv_b - mean * mean                     # biased variance

        gamma_l = gammas[l:l + 1, :]                       # (1, C)
        beta_l = betas[l:l + 1, :]                         # (1, C)
        scale = gamma_l * jax.lax.rsqrt(var + BN_EPS)      # (1, C)
        shift = beta_l - mean * scale                      # (1, C)
        h_bn = h * scale + shift                           # 2 vec-ops / element

        # Activation: ReLU for hidden blocks, Tanh (EUP) for the output block.
        if l < num_layers - 1:
            act = jnp.maximum(h_bn, 0.0)
        else:
            act = jnp.tanh(h_bn)

        # Residual connection.
        x = act + x

    o_ref[...] = x.astype(o_ref.dtype)


def prepare_generator_params(weights, gammas, betas, *, transpose_from_torch=False):
    """One-time parameter preparation (do NOT run per forward call).

    weights: (L, C, C). If they come from PyTorch nn.Linear state_dict
    ((out, in) layout, forward computes x @ W.T) pass transpose_from_torch=True.
    Returns (weights_bf16, gammas_f32, betas_f32).
    """
    w = jnp.asarray(weights)
    if transpose_from_torch:
        w = jnp.swapaxes(w, -1, -2)
    return (w.astype(jnp.bfloat16),
            jnp.asarray(gammas, dtype=jnp.float32),
            jnp.asarray(betas, dtype=jnp.float32))


@jax.jit
def generator_forward(noise, weights_bf16, gammas_f32, betas_f32):
    """noise: (B, C) float; params from `prepare_generator_params`."""
    B, C = noise.shape
    L = weights_bf16.shape[0]

    # Resident footprint: bf16 weights + f32 x/out + a few f32 intermediates.
    resident = L * C * C * 2 + 2 * B * C * 4
    vmem_limit = int(min(60 * 2**20, max(32 * 2**20, 4 * resident)))

    vmem = pltpu.MemorySpace.VMEM
    return pl.pallas_call(
        generator_kernel,
        out_shape=jax.ShapeDtypeStruct((B, C), jnp.float32),
        in_specs=[
            pl.BlockSpec(memory_space=vmem),  # noise
            pl.BlockSpec(memory_space=vmem),  # weights (bf16, ~96 KiB)
            pl.BlockSpec(memory_space=vmem),  # gammas
            pl.BlockSpec(memory_space=vmem),  # betas
        ],
        out_specs=pl.BlockSpec(memory_space=vmem),
        compiler_params=pltpu.CompilerParams(vmem_limit_bytes=vmem_limit),
    )(noise, weights_bf16, gammas_f32, betas_f32)


def generator_reference(noise, weights, gammas, betas, *, bf16_matmul=True):
    """Pure-JAX reference mirroring the PyTorch forward (and the kernel's
    bf16-operand / f32-accumulate matmul when bf16_matmul=True)."""
    x = noise.astype(jnp.float32)
    L = weights.shape[0]
    for l in range(L):
        if bf16_matmul:
            h = jnp.dot(x.astype(jnp.bfloat16), weights[l].astype(jnp.bfloat16),
                        preferred_element_type=jnp.float32)
        else:
            h = x @ weights[l]
        mean = jnp.mean(h, axis=0, keepdims=True)
        var = jnp.mean((h - mean) ** 2, axis=0, keepdims=True)
        h = (h - mean) / jnp.sqrt(var + BN_EPS)
        h = h * gammas[l][None, :] + betas[l][None, :]
        a = jnp.maximum(h, 0.0) if l < L - 1 else jnp.tanh(h)
        x = a + x
    return x


if __name__ == "__main__":
    key = jax.random.PRNGKey(0)
    k_noise, k_w, k_g, k_b = jax.random.split(key, 4)

    B = 8  # small batch, aligned to the 8-sublane tile
    C = CODE_SIZE

    noise = jax.random.normal(k_noise, (B, C), dtype=jnp.float32)

    # Deterministic synthetic parameters (shapes follow the module's __init__),
    # already in the h = x @ W[l] layout.
    weights = jax.random.normal(k_w, (NUM_LAYERS, C, C), dtype=jnp.float32) / jnp.sqrt(C)
    gammas = 1.0 + 0.1 * jax.random.normal(k_g, (NUM_LAYERS, C), dtype=jnp.float32)
    betas = 0.1 * jax.random.normal(k_b, (NUM_LAYERS, C), dtype=jnp.float32)

    # One-time param prep (casts hoisted off the per-call dispatch path).
    w_bf16, g_f32, b_f32 = prepare_generator_params(weights, gammas, betas)

    out = generator_forward(noise, w_bf16, g_f32, b_f32)
    out = jax.block_until_ready(out)
    assert out.shape == (B, C)

    # Tight check vs a reference using the same bf16-operand matmul.
    ref_bf16 = generator_reference(noise, weights, gammas, betas, bf16_matmul=True)
    assert jnp.allclose(out, ref_bf16, atol=2e-3, rtol=2e-3), "mismatch vs bf16 reference"

    # Loose sanity check vs the full-f32 PyTorch-equivalent math.
    ref_f32 = generator_reference(noise, weights, gammas, betas, bf16_matmul=False)
    assert jnp.allclose(out, ref_f32, atol=1e-1, rtol=1e-1), "mismatch vs f32 reference"

    print("KERNEL_OK")
</pallas_src>

<mosaic_0001>
module attributes {stable_mosaic.version = 11 : i64} {
  func.func @generator_kernel(%arg0: memref<8x128xf32, #tpu.memory_space<vmem>>, %arg1: memref<3x128x128xbf16, #tpu.memory_space<vmem>>, %arg2: memref<3x128xf32, #tpu.memory_space<vmem>>, %arg3: memref<3x128xf32, #tpu.memory_space<vmem>>, %arg4: memref<8x128xf32, #tpu.memory_space<vmem>>) attributes {dimension_semantics = [], scalar_prefetch = 0 : i64, scratch_operands = 0 : i64, tpu.core_type = #tpu.core_type<tc>} {
    %c0 = arith.constant 0 : index
    %c0_0 = arith.constant 0 : index
    %0 = vector.load %arg0[%c0, %c0_0] : memref<8x128xf32, #tpu.memory_space<vmem>>, vector<8x128xf32>
    %c0_1 = arith.constant 0 : index
    %c0_2 = arith.constant 0 : index
    %1 = vector.load %arg2[%c0_1, %c0_2] : memref<3x128xf32, #tpu.memory_space<vmem>>, vector<3x128xf32>
    %c0_3 = arith.constant 0 : index
    %c0_4 = arith.constant 0 : index
    %2 = vector.load %arg3[%c0_3, %c0_4] : memref<3x128xf32, #tpu.memory_space<vmem>>, vector<3x128xf32>
    %3 = arith.truncf %0 : vector<8x128xf32> to vector<8x128xbf16>
    %c0_5 = arith.constant 0 : index
    %c0_6 = arith.constant 0 : index
    %c0_7 = arith.constant 0 : index
    %4 = vector.load %arg1[%c0_5, %c0_6, %c0_7] : memref<3x128x128xbf16, #tpu.memory_space<vmem>>, vector<1x128x128xbf16>
    %5 = vector.shape_cast %4 : vector<1x128x128xbf16> to vector<128x128xbf16>
    %cst = arith.constant dense<0.000000e+00> : vector<8x128xf32>
    %6 = tpu.matmul %3, %5, %cst {dimension_numbers = #tpu.dot_dimension_numbers<[1], [0], [0], [1], [0, 0, 1, 1], [], []>} : vector<8x128xbf16>, vector<128x128xbf16>, vector<8x128xf32> -> vector<8x128xf32>
    %7 = arith.mulf %6, %6 : vector<8x128xf32>
    %cst_8 = arith.constant dense<0.000000e+00> : vector<128xf32>
    %8 = vector.multi_reduction <add>, %6, %cst_8 [0] : vector<8x128xf32> to vector<128xf32>
    %9 = vector.shape_cast %8 : vector<128xf32> to vector<1x128xf32>
    %cst_9 = arith.constant dense<0.000000e+00> : vector<128xf32>
    %10 = vector.multi_reduction <add>, %7, %cst_9 [0] : vector<8x128xf32> to vector<128xf32>
    %11 = vector.shape_cast %10 : vector<128xf32> to vector<1x128xf32>
    %cst_10 = arith.constant 1.250000e-01 : f32
    %12 = vector.broadcast %cst_10 : f32 to vector<1x128xf32>
    %13 = arith.mulf %9, %12 : vector<1x128xf32>
    %cst_11 = arith.constant 1.250000e-01 : f32
    %14 = vector.broadcast %cst_11 : f32 to vector<1x128xf32>
    %15 = arith.mulf %11, %14 : vector<1x128xf32>
    %16 = arith.mulf %13, %13 : vector<1x128xf32>
    %17 = arith.subf %15, %16 : vector<1x128xf32>
    %18 = vector.extract_strided_slice %1 {offsets = [0, 0], sizes = [1, 128], strides = [1, 1]} : vector<3x128xf32> to vector<1x128xf32>
    %19 = vector.extract_strided_slice %2 {offsets = [0, 0], sizes = [1, 128], strides = [1, 1]} : vector<3x128xf32> to vector<1x128xf32>
    %cst_12 = arith.constant 9.99999974E-6 : f32
    %20 = vector.broadcast %cst_12 : f32 to vector<1x128xf32>
    %21 = arith.addf %17, %20 : vector<1x128xf32>
    %22 = math.rsqrt %21 : vector<1x128xf32>
    %23 = arith.mulf %18, %22 : vector<1x128xf32>
    %24 = arith.mulf %13, %23 : vector<1x128xf32>
    %25 = arith.subf %19, %24 : vector<1x128xf32>
    %26 = vector.broadcast %23 : vector<1x128xf32> to vector<8x128xf32>
    %27 = arith.mulf %6, %26 : vector<8x128xf32>
    %28 = vector.broadcast %25 : vector<1x128xf32> to vector<8x128xf32>
    %29 = arith.addf %27, %28 : vector<8x128xf32>
    %cst_13 = arith.constant 0.000000e+00 : f32
    %30 = vector.broadcast %cst_13 : f32 to vector<8x128xf32>
    %31 = arith.maximumf %29, %30 : vector<8x128xf32>
    %32 = arith.addf %31, %0 : vector<8x128xf32>
    %33 = arith.truncf %32 : vector<8x128xf32> to vector<8x128xbf16>
    %c1 = arith.constant 1 : index
    %c0_14 = arith.constant 0 : index
    %c0_15 = arith.constant 0 : index
    %34 = vector.load %arg1[%c1, %c0_14, %c0_15] : memref<3x128x128xbf16, #tpu.memory_space<vmem>>, vector<1x128x128xbf16>
    %35 = vector.shape_cast %34 : vector<1x128x128xbf16> to vector<128x128xbf16>
    %cst_16 = arith.constant dense<0.000000e+00> : vector<8x128xf32>
    %36 = tpu.matmul %33, %35, %cst_16 {dimension_numbers = #tpu.dot_dimension_numbers<[1], [0], [0], [1], [0, 0, 1, 1], [], []>} : vector<8x128xbf16>, vector<128x128xbf16>, vector<8x128xf32> -> vector<8x128xf32>
    %37 = arith.mulf %36, %36 : vector<8x128xf32>
    %cst_17 = arith.constant dense<0.000000e+00> : vector<128xf32>
    %38 = vector.multi_reduction <add>, %36, %cst_17 [0] : vector<8x128xf32> to vector<128xf32>
    %39 = vector.shape_cast %38 : vector<128xf32> to vector<1x128xf32>
    %cst_18 = arith.constant dense<0.000000e+00> : vector<128xf32>
    %40 = vector.multi_reduction <add>, %37, %cst_18 [0] : vector<8x128xf32> to vector<128xf32>
    %41 = vector.shape_cast %40 : vector<128xf32> to vector<1x128xf32>
    %cst_19 = arith.constant 1.250000e-01 : f32
    %42 = vector.broadcast %cst_19 : f32 to vector<1x128xf32>
    %43 = arith.mulf %39, %42 : vector<1x128xf32>
    %cst_20 = arith.constant 1.250000e-01 : f32
    %44 = vector.broadcast %cst_20 : f32 to vector<1x128xf32>
    %45 = arith.mulf %41, %44 : vector<1x128xf32>
    %46 = arith.mulf %43, %43 : vector<1x128xf32>
    %47 = arith.subf %45, %46 : vector<1x128xf32>
    %48 = vector.extract_strided_slice %1 {offsets = [1, 0], sizes = [1, 128], strides = [1, 1]} : vector<3x128xf32> to vector<1x128xf32>
    %49 = vector.extract_strided_slice %2 {offsets = [1, 0], sizes = [1, 128], strides = [1, 1]} : vector<3x128xf32> to vector<1x128xf32>
    %cst_21 = arith.constant 9.99999974E-6 : f32
    %50 = vector.broadcast %cst_21 : f32 to vector<1x128xf32>
    %51 = arith.addf %47, %50 : vector<1x128xf32>
    %52 = math.rsqrt %51 : vector<1x128xf32>
    %53 = arith.mulf %48, %52 : vector<1x128xf32>
    %54 = arith.mulf %43, %53 : vector<1x128xf32>
    %55 = arith.subf %49, %54 : vector<1x128xf32>
    %56 = vector.broadcast %53 : vector<1x128xf32> to vector<8x128xf32>
    %57 = arith.mulf %36, %56 : vector<8x128xf32>
    %58 = vector.broadcast %55 : vector<1x128xf32> to vector<8x128xf32>
    %59 = arith.addf %57, %58 : vector<8x128xf32>
    %cst_22 = arith.constant 0.000000e+00 : f32
    %60 = vector.broadcast %cst_22 : f32 to vector<8x128xf32>
    %61 = arith.maximumf %59, %60 : vector<8x128xf32>
    %62 = arith.addf %61, %32 : vector<8x128xf32>
    %63 = arith.truncf %62 : vector<8x128xf32> to vector<8x128xbf16>
    %c2 = arith.constant 2 : index
    %c0_23 = arith.constant 0 : index
    %c0_24 = arith.constant 0 : index
    %64 = vector.load %arg1[%c2, %c0_23, %c0_24] : memref<3x128x128xbf16, #tpu.memory_space<vmem>>, vector<1x128x128xbf16>
    %65 = vector.shape_cast %64 : vector<1x128x128xbf16> to vector<128x128xbf16>
    %cst_25 = arith.constant dense<0.000000e+00> : vector<8x128xf32>
    %66 = tpu.matmul %63, %65, %cst_25 {dimension_numbers = #tpu.dot_dimension_numbers<[1], [0], [0], [1], [0, 0, 1, 1], [], []>} : vector<8x128xbf16>, vector<128x128xbf16>, vector<8x128xf32> -> vector<8x128xf32>
    %67 = arith.mulf %66, %66 : vector<8x128xf32>
    %cst_26 = arith.constant dense<0.000000e+00> : vector<128xf32>
    %68 = vector.multi_reduction <add>, %66, %cst_26 [0] : vector<8x128xf32> to vector<128xf32>
    %69 = vector.shape_cast %68 : vector<128xf32> to vector<1x128xf32>
    %cst_27 = arith.constant dense<0.000000e+00> : vector<128xf32>
    %70 = vector.multi_reduction <add>, %67, %cst_27 [0] : vector<8x128xf32> to vector<128xf32>
    %71 = vector.shape_cast %70 : vector<128xf32> to vector<1x128xf32>
    %cst_28 = arith.constant 1.250000e-01 : f32
    %72 = vector.broadcast %cst_28 : f32 to vector<1x128xf32>
    %73 = arith.mulf %69, %72 : vector<1x128xf32>
    %cst_29 = arith.constant 1.250000e-01 : f32
    %74 = vector.broadcast %cst_29 : f32 to vector<1x128xf32>
    %75 = arith.mulf %71, %74 : vector<1x128xf32>
    %76 = arith.mulf %73, %73 : vector<1x128xf32>
    %77 = arith.subf %75, %76 : vector<1x128xf32>
    %78 = vector.extract_strided_slice %1 {offsets = [2, 0], sizes = [1, 128], strides = [1, 1]} : vector<3x128xf32> to vector<1x128xf32>
    %79 = vector.extract_strided_slice %2 {offsets = [2, 0], sizes = [1, 128], strides = [1, 1]} : vector<3x128xf32> to vector<1x128xf32>
    %cst_30 = arith.constant 9.99999974E-6 : f32
    %80 = vector.broadcast %cst_30 : f32 to vector<1x128xf32>
    %81 = arith.addf %77, %80 : vector<1x128xf32>
    %82 = math.rsqrt %81 : vector<1x128xf32>
    %83 = arith.mulf %78, %82 : vector<1x128xf32>
    %84 = arith.mulf %73, %83 : vector<1x128xf32>
    %85 = arith.subf %79, %84 : vector<1x128xf32>
    %86 = vector.broadcast %83 : vector<1x128xf32> to vector<8x128xf32>
    %87 = arith.mulf %66, %86 : vector<8x128xf32>
    %88 = vector.broadcast %85 : vector<1x128xf32> to vector<8x128xf32>
    %89 = arith.addf %87, %88 : vector<8x128xf32>
    %90 = math.tanh %89 : vector<8x128xf32>
    %91 = arith.addf %90, %62 : vector<8x128xf32>
    %c0_31 = arith.constant 0 : index
    %c0_32 = arith.constant 0 : index
    %92 = vector.load %arg4[%c0_31, %c0_32] : memref<8x128xf32, #tpu.memory_space<vmem>>, vector<8x128xf32>
    tpu.vector_store %arg4[%c0_31, %c0_32], %91 {strides = array<i32>} : memref<8x128xf32, #tpu.memory_space<vmem>>, vector<8x128xf32>,
    return
  }
}

</mosaic_0001>

<bundles_post_ra>
// kernel: generator_forward.1
= control target key start
LH: loop header
LB: loop body
LE: loop exit
PB: predicated region body
PF: predicated region fallthrough
CT: control target
= control target key end

     0   :  { %9 = vsyncpa [#allocation3], 0  ;;  %s837_s0 = inlined_call_operand.hbm [shape: f32[8,128], index: 0, kind: input, shape index: {}]   ;;  %s838_s1 = inlined_call_operand.hbm [shape: bf16[3,128,128], index: 1, kind: input, shape index: {}]   ;;  %s839_s2 = inlined_call_operand.vmem [shape: f32[3,128], index: 2, kind: input, shape index: {}]   ;;  %s840_s3 = inlined_call_operand.vmem [shape: f32[3,128], index: 3, kind: input, shape index: {}]   ;;  %s841_s4 = inlined_call_operand.hbm [shape: f32[8,128], index: 4, kind: output, shape index: {}]  }
   0x1   :  { %10 = vsyncpa [#allocation6], 0 }
   0x2   :  { %11 = vsyncpa [#allocation4], 0  ;;  %s706_s15 = smov [#allocation2]   ;;  %s707_s17 = smov [#allocation5]  }
   0x3   :  { %s18_s16 = sshll.u32 %s706_s15, 4  ;;  %s27_s18 = sshll.u32 %s707_s17, 4  ;;  %s19_s16 = int_to_ptr.vmem [resolvable:$true] %s18_s16  ;;  %s738_s18 = int_to_ptr.vmem [resolvable:$true] %s27_s18 }
   0x4   :  { %s634_s21 = scalar_lea.hbm %s837_s0, 128 }
   0x5   :  { %p635_p0 = scmp.ne.s32.totalorder %s837_s0, %s634_s21  ;;  %p638_p1 = scmp.lt.u32.totalorder %s634_s21, %s837_s0 }
   0x7   :  { %p640_p2 = pnand %p638_p1, %p635_p0 }
   0x9   :  { %643 = shalt.err (!%p640_p2)
}
   0xa   :  { %s644_s26 = scalar_lea.vmem %s19_s16, 128  ;;  %p649_p4 = scmp.lt.s32.totalorder %s19_s16, %s19_s16 }
   0xb   :  { %p645_p3 = scmp.ne.s32.totalorder %s19_s16, %s644_s26  ;;  %p650_p5 = scmp.lt.s32.totalorder %s644_s26, %s644_s26 }
   0xd   :  { %p651_p6 = por %p650_p5, %p649_p4 }
   0xf   :  { %p652_p7 = pnand %p651_p6, %p645_p3 }
  0x11   :  { %655 = shalt.err (!%p652_p7)
}
  0x12   :  { %21 = dma.hbm_to_vmem [thread:$0]  %s837_s0, 128, %s19_s16, [#allocation3]  }
  0x13   :  { %s656_s5 = scalar_lea.hbm %s838_s1, 3072 }
  0x14   :  { %p657_p8 = scmp.ne.s32.totalorder %s838_s1, %s656_s5  ;;  %p660_p9 = scmp.lt.u32.totalorder %s656_s5, %s838_s1 }
  0x16   :  { %p662_p10 = pnand %p660_p9, %p657_p8 }
  0x18   :  { %665 = shalt.err (!%p662_p10)
}
  0x19   :  { %s666_s10 = scalar_lea.vmem %s738_s18, 3072  ;;  %p671_p12 = scmp.lt.s32.totalorder %s738_s18, %s738_s18 }
  0x1a   :  { %p667_p11 = scmp.ne.s32.totalorder %s738_s18, %s666_s10  ;;  %p672_p13 = scmp.lt.s32.totalorder %s666_s10, %s666_s10 }
  0x1c   :  { %p673_p0 = por %p672_p13, %p671_p12 }
  0x1e   :  { %p674_p1 = pnand %p673_p0, %p667_p11 }
  0x20   :  { %677 = shalt.err (!%p674_p1)
}
  0x21   :  { %s708_s0 = smov 64   ;;  %s709_s11 = smov 4  }
  0x22   :  { %33 = dma.hbm_to_vmem [thread:$0]  %s838_s1, 3072, %s738_s18, [#allocation6], %s708_s0, %s708_s0, %s709_s11  }
  0x23   :  { %700 = dma.done.wait [#allocation3], 128  }
  0x24   :  { %701 = vsyncadd [#allocation3], 4294967168 }
  0x25   :  { %702 = dma.done.wait [#allocation6], 3072  }
  0x26   :  { %703 = vsyncadd [#allocation6], 4294964224  ;;  %v710_v0 = vmov 0.0   ;;  %vm711_vm0 = vmmov 0   ;;  %v602_v1 = vld [vmem:[#allocation5] sm:$0xff]   ;;  %v603_v2 = vld [vmem:[#allocation5 + $0x8] sm:$0xff]   ;;  %v175_v41 = vlaneseq }
  0x27   :  { %535 = vmatprep.subr.bf16.mxu0 %v710_v0  ;;  %551 = vmatprep.mubr.msk.bf16.mxu0 %vm711_vm0, %v710_v0  ;;  %v604_v3 = vld [vmem:[#allocation5 + $0x10] sm:$0xff]   ;;  %v605_v4 = vld [vmem:[#allocation5 + $0x18] sm:$0xff]   ;;  %v606_v5 = vld [vmem:[#allocation5 + $0x20] sm:$0xff]  }
  0x28   :  { %555 = vmatprep.subr.bf16.mxu1 %v710_v0  ;;  %571 = vmatprep.mubr.msk.bf16.mxu1 %vm711_vm0, %v710_v0  ;;  %v607_v6 = vld [vmem:[#allocation5 + $0x28] sm:$0xff]   ;;  %v608_v7 = vld [vmem:[#allocation5 + $0x30] sm:$0xff]   ;;  %v609_v8 = vld [vmem:[#allocation5 + $0x38] sm:$0xff]   ;;  %v796_v42 = vshrl.u32 %v175_v41, 7 }
  0x29   :  { %536 = vmatpush3.bf16.msra.mxu0 %v602_v1  ;;  %v781_v9 = vld [vmem:[#allocation2] sm:$0xff]  ;;  %v610_v11 = vld [vmem:[#allocation5 + $0x40] sm:$0xff]   ;;  %v611_v12 = vld [vmem:[#allocation5 + $0x48] sm:$0xff]  }
  0x2a   :  { %537 = vmatprep.subr.bf16.mxu0 %v710_v0  ;;  %v48_v10 = vpack.c.bf16 %v781_v9, %v781_v9  ;;  %556 = vmatpush3.bf16.msra.mxu1 %v610_v11  ;;  %v612_v13 = vld [vmem:[#allocation5 + $0x50] sm:$0xff]   ;;  %v613_v14 = vld [vmem:[#allocation5 + $0x58] sm:$0xff]   ;;  %v614_v15 = vld [vmem:[#allocation5 + $0x60] sm:$0xff]   ;;  %v177_v44 = vsub.s32 0, %v796_v42 }
  0x2b   :  { %557 = vmatprep.subr.bf16.mxu1 %v710_v0  ;;  %v615_v16 = vld [vmem:[#allocation5 + $0x68] sm:$0xff]   ;;  %v616_v17 = vld [vmem:[#allocation5 + $0x70] sm:$0xff]   ;;  %v617_v18 = vld [vmem:[#allocation5 + $0x78] sm:$0xff]  }
  0x2c   :  { %v801_v43 = vld [vmem:[%s839_s2] sm:$0x7]  ;;  %v618_v57 = vld [vmem:[#allocation5 + $0x80] sm:$0xff]   ;;  %v619_v58 = vld [vmem:[#allocation5 + $0x88] sm:$0xff]   ;;  %s712_s2 = smov [#allocation7]  }
  0x2d   :  { %538 = vmatpush3.bf16.msra.mxu0 %v603_v2  ;;  %v808_v47 = vld [vmem:[%s840_s3] sm:$0x7]  ;;  %v620_v59 = vld [vmem:[#allocation5 + $0x90] sm:$0xff]   ;;  %v622_v61 = vld [vmem:[#allocation5 + $0xa0] sm:$0xff]   ;;  %s474_s3 = sshll.u32 %s712_s2, 4  ;;  %s475_s3 = int_to_ptr.vmem [resolvable:$true] %s474_s3 }
  0x2e   :  { %539 = vmatprep.subr.bf16.mxu0 %v710_v0  ;;  %558 = vmatpush3.bf16.msra.mxu1 %v611_v12  ;;  %v621_v60 = vld [vmem:[#allocation5 + $0x98] sm:$0xff]   ;;  %v623_v62 = vld [vmem:[#allocation5 + $0xa8] sm:$0xff]   ;;  %v624_v63 = vld [vmem:[#allocation5 + $0xb0] sm:$0xff]   ;;  %s678_s17 = scalar_lea.vmem %s475_s3, 128  ;;  %p683_p3 = scmp.lt.s32.totalorder %s475_s3, %s475_s3 }
  0x2f   :  { %559 = vmatprep.subr.bf16.mxu1 %v710_v0  ;;  %v625_v1 = vld [vmem:[#allocation5 + $0xb8] sm:$0xff]   ;;  %p679_p2 = scmp.ne.s32.totalorder %s475_s3, %s678_s17  ;;  %p684_p4 = scmp.lt.s32.totalorder %s678_s17, %s678_s17 }
  0x31   :  { %540 = vmatpush3.bf16.msra.mxu0 %v604_v3  ;;  %p685_p5 = por %p684_p4, %p683_p3 }
  0x32   :  { %541 = vmatprep.subr.bf16.mxu0 %v710_v0  ;;  %560 = vmatpush3.bf16.msra.mxu1 %v612_v13 }
  0x33   :  { %561 = vmatprep.subr.bf16.mxu1 %v710_v0  ;;  %p686_p6 = pnand %p685_p5, %p679_p2 }
  0x35   :  { %542 = vmatpush3.bf16.msra.mxu0 %v605_v4 }
  0x36   :  { %543 = vmatprep.subr.bf16.mxu0 %v710_v0  ;;  %562 = vmatpush3.bf16.msra.mxu1 %v613_v14 }
  0x37   :  { %563 = vmatprep.subr.bf16.mxu1 %v710_v0 }
  0x39   :  { %544 = vmatpush3.bf16.msra.mxu0 %v606_v5 }
  0x3a   :  { %545 = vmatprep.subr.bf16.mxu0 %v710_v0  ;;  %564 = vmatpush3.bf16.msra.mxu1 %v614_v15 }
  0x3b   :  { %565 = vmatprep.subr.bf16.mxu1 %v710_v0 }
  0x3d   :  { %546 = vmatpush3.bf16.msra.mxu0 %v607_v6 }
  0x3e   :  { %547 = vmatprep.subr.bf16.mxu0 %v710_v0  ;;  %566 = vmatpush3.bf16.msra.mxu1 %v615_v16 }
  0x3f   :  { %567 = vmatprep.subr.bf16.mxu1 %v710_v0 }
  0x41   :  { %548 = vmatpush3.bf16.msra.mxu0 %v608_v7 }
  0x42   :  { %549 = vmatprep.subr.bf16.mxu0 %v710_v0  ;;  %568 = vmatpush3.bf16.msra.mxu1 %v616_v17 }
  0x43   :  { %569 = vmatprep.subr.bf16.mxu1 %v710_v0 }
  0x45   :  { %550 = vmatpush3.bf16.msra.mxu0 %v609_v8 }
  0x46   :  { %575 = vmatprep.subr.bf16.mxu0 %v710_v0  ;;  %570 = vmatpush3.bf16.msra.mxu1 %v617_v18 }
  0x48   :  { %552 = vmatmul.mubr.bf16.vlgmr.msra.gmra.mrb[0].mxu0 %v48_v10 }
  0x49   :  { %591 = vmatprep.mubr.msk.bf16.mxu0 %vm711_vm0, %v710_v0  ;;  %576 = vmatpush3.bf16.msra.mxu0 %v618_v57 }
  0x4a   :  { %577 = vmatprep.subr.bf16.mxu0 %v710_v0 }
  0x4d   :  { %578 = vmatpush3.bf16.msra.mxu0 %v619_v58 }
  0x4e   :  { %579 = vmatprep.subr.bf16.mxu0 %v710_v0 }
  0x51   :  { %580 = vmatpush3.bf16.msra.mxu0 %v620_v59 }
  0x52   :  { %581 = vmatprep.subr.bf16.mxu0 %v710_v0 }
  0x55   :  { %582 = vmatpush3.bf16.msra.mxu0 %v621_v60  ;;  %v457_v60 = vsub.s32 2, %v796_v42 }
  0x56   :  { %583 = vmatprep.subr.bf16.mxu0 %v710_v0 }
  0x59   :  { %584 = vmatpush3.bf16.msra.mxu0 %v622_v61 }
  0x5a   :  { %585 = vmatprep.subr.bf16.mxu0 %v710_v0 }
  0x5d   :  { %586 = vmatpush3.bf16.msra.mxu0 %v623_v62 }
  0x5e   :  { %587 = vmatprep.subr.bf16.mxu0 %v710_v0 }
  0x61   :  { %588 = vmatpush3.bf16.msra.mxu0 %v624_v63 }
  0x62   :  { %589 = vmatprep.subr.bf16.mxu0 %v710_v0 }
  0x65   :  { %590 = vmatpush3.bf16.msra.mxu0 %v625_v1 }
 0x11b   :  { %v147_v19 = vpop.f32.mrb[0].mxu0 }
 0x11c   :  { %v153_v20 = vmul.f32 %v147_v19, %v147_v19  ;;  %v154_v21 = vrot.slane %v147_v19, 4  ;;  %v553_v22 = vpop.f32.mrb[1].mxu0 }
 0x11d   :  { %v150_v23 = vpop.f32.mrb[2].mxu0 }
 0x11e   :  { %v155_v24 = vadd.f32 %v154_v21, %v147_v19  ;;  %v160_v25 = vrot.slane %v153_v20, 4  ;;  %v554_v26 = vpop.f32.mrb[3].mxu0  ;;  %v317_v23 = vsub.s32 1, %v796_v42 }
 0x120   :  { %v156_v27 = vrot.slane %v155_v24, 2  ;;  %v161_v28 = vadd.f32 %v160_v25, %v153_v20 }
 0x122   :  { %v157_v29 = vadd.f32 %v156_v27, %v155_v24  ;;  %v162_v30 = vrot.slane %v161_v28, 2 }
 0x124   :  { %v158_v31 = vrot.slane %v157_v29, 1  ;;  %v163_v32 = vadd.f32 %v162_v30, %v161_v28 }
 0x126   :  { %v159_v33 = vadd.f32 %v158_v31, %v157_v29  ;;  %v164_v34 = vrot.slane %v163_v32, 1 }
 0x128   :  { %v165_v35 = vadd.f32 %v164_v34, %v163_v32  ;;  %v166_v36 = vmul.f32 0.125, %v159_v33 }
 0x12a   :  { %v167_v37 = vmul.f32 0.125, %v165_v35  ;;  %v168_v38 = vmul.f32 %v166_v36, %v166_v36 }
 0x12c   :  { %v169_v39 = vsub.f32 %v167_v37, %v168_v38 }
 0x12e   :  { %v170_v40 = vadd.f32 1e-05, %v169_v39 }
 0x130   :  { %626 = vrsqrt.f32 %v170_v40 }
 0x13a   :  { %v627_v45 = vpop.eup %626 }
 0x13b   :  { %v172_v46 = vmul.f32 %v627_v45, %v801_v43 }
 0x13d   :  { %v173_v48 = vmul.f32 %v172_v46, %v166_v36  ;;  %v178_v49 = vrot.slane %v172_v46, %v177_v44 }
 0x13f   :  { %v174_v50 = vsub.f32 %v808_v47, %v173_v48  ;;  %v179_v51 = vmul.f32 %v178_v49, %v147_v19 }
 0x141   :  { %v183_v52 = vrot.slane %v174_v50, %v177_v44 }
 0x143   :  { %v184_v53 = vadd.f32 %v183_v52, %v179_v51 }
 0x145   :  { %v185_v54 = vmax.f32 %v184_v53, 0.0 }
 0x147   :  { %v186_v55 = vadd.f32 %v185_v54, %v781_v9 }
 0x149   :  { %v187_v56 = vpack.c.bf16 %v186_v55, %v186_v55 }
 0x14b   :  { %572 = vmatmul.mubr.bf16.vlgmr.msra.gmra.mrb[0].mxu1 %v187_v56 }
 0x21e   :  { %v287_v2 = vpop.f32.mrb[0].mxu1 }
 0x21f   :  { %v293_v3 = vmul.f32 %v287_v2, %v287_v2  ;;  %v294_v4 = vrot.slane %v287_v2, 4  ;;  %v573_v5 = vpop.f32.mrb[1].mxu1 }
 0x220   :  { %v290_v6 = vpop.f32.mrb[2].mxu1 }
 0x221   :  { %v295_v7 = vadd.f32 %v294_v4, %v287_v2  ;;  %v300_v8 = vrot.slane %v293_v3, 4  ;;  %v574_v9 = vpop.f32.mrb[3].mxu1 }
 0x223   :  { %v296_v10 = vrot.slane %v295_v7, 2  ;;  %v301_v11 = vadd.f32 %v300_v8, %v293_v3 }
 0x225   :  { %v297_v12 = vadd.f32 %v296_v10, %v295_v7  ;;  %v302_v13 = vrot.slane %v301_v11, 2 }
 0x227   :  { %v298_v14 = vrot.slane %v297_v12, 1  ;;  %v303_v15 = vadd.f32 %v302_v13, %v301_v11 }
 0x229   :  { %v299_v16 = vadd.f32 %v298_v14, %v297_v12  ;;  %v304_v17 = vrot.slane %v303_v15, 1 }
 0x22b   :  { %v305_v18 = vadd.f32 %v304_v17, %v303_v15  ;;  %v306_v0 = vmul.f32 0.125, %v299_v16 }
 0x22d   :  { %v307_v19 = vmul.f32 0.125, %v305_v18  ;;  %v308_v20 = vmul.f32 %v306_v0, %v306_v0 }
 0x22f   :  { %v309_v21 = vsub.f32 %v307_v19, %v308_v20 }
 0x231   :  { %v310_v22 = vadd.f32 1e-05, %v309_v21 }
 0x233   :  { %628 = vrsqrt.f32 %v310_v22 }
 0x23d   :  { %v629_v24 = vpop.eup %628 }
 0x23e   :  { %v312_v25 = vmul.f32 %v629_v24, %v801_v43 }
 0x240   :  { %v313_v26 = vmul.f32 %v312_v25, %v306_v0  ;;  %v318_v27 = vrot.slane %v312_v25, %v317_v23 }
 0x242   :  { %v314_v28 = vsub.f32 %v808_v47, %v313_v26  ;;  %v319_v29 = vmul.f32 %v318_v27, %v287_v2 }
 0x244   :  { %v323_v30 = vrot.slane %v314_v28, %v317_v23 }
 0x246   :  { %v324_v31 = vadd.f32 %v323_v30, %v319_v29 }
 0x248   :  { %v325_v32 = vmax.f32 %v324_v31, 0.0 }
 0x24a   :  { %v326_v33 = vadd.f32 %v325_v32, %v186_v55 }
 0x24c   :  { %v327_v34 = vpack.c.bf16 %v326_v33, %v326_v33 }
 0x24e   :  { %592 = vmatmul.mubr.bf16.vlgmr.msra.gmra.mrb[4].mxu0 %v327_v34 }
 0x321   :  { %v427_v35 = vpop.f32.mrb[4].mxu0 }
 0x322   :  { %v433_v36 = vmul.f32 %v427_v35, %v427_v35  ;;  %v434_v37 = vrot.slane %v427_v35, 4  ;;  %v593_v38 = vpop.f32.mrb[5].mxu0 }
 0x323   :  { %v430_v39 = vpop.f32.mrb[6].mxu0 }
 0x324   :  { %v435_v40 = vadd.f32 %v434_v37, %v427_v35  ;;  %v440_v41 = vrot.slane %v433_v36, 4  ;;  %v594_v44 = vpop.f32.mrb[7].mxu0 }
 0x326   :  { %v436_v45 = vrot.slane %v435_v40, 2  ;;  %v441_v46 = vadd.f32 %v440_v41, %v433_v36 }
 0x328   :  { %v437_v48 = vadd.f32 %v436_v45, %v435_v40  ;;  %v442_v49 = vrot.slane %v441_v46, 2 }
 0x32a   :  { %v438_v50 = vrot.slane %v437_v48, 1  ;;  %v443_v51 = vadd.f32 %v442_v49, %v441_v46 }
 0x32c   :  { %v439_v52 = vadd.f32 %v438_v50, %v437_v48  ;;  %v444_v53 = vrot.slane %v443_v51, 1 }
 0x32e   :  { %v445_v54 = vadd.f32 %v444_v53, %v443_v51  ;;  %v446_v55 = vmul.f32 0.125, %v439_v52 }
 0x330   :  { %v447_v56 = vmul.f32 0.125, %v445_v54  ;;  %v448_v57 = vmul.f32 %v446_v55, %v446_v55 }
 0x332   :  { %v449_v58 = vsub.f32 %v447_v56, %v448_v57 }
 0x334   :  { %v450_v59 = vadd.f32 1e-05, %v449_v58 }
 0x336   :  { %630 = vrsqrt.f32 %v450_v59 }
 0x340   :  { %v631_v61 = vpop.eup %630 }
 0x341   :  { %v452_v62 = vmul.f32 %v631_v61, %v801_v43 }
 0x343   :  { %v453_v63 = vmul.f32 %v452_v62, %v446_v55  ;;  %v458_v1 = vrot.slane %v452_v62, %v457_v60 }
 0x345   :  { %v454_v2 = vsub.f32 %v808_v47, %v453_v63  ;;  %v459_v3 = vmul.f32 %v458_v1, %v427_v35 }
 0x347   :  { %v463_v4 = vrot.slane %v454_v2, %v457_v60 }
 0x349   :  { %v464_v5 = vadd.f32 %v463_v4, %v459_v3 }
 0x34b   :  { %632 = vtanh.f32 %v464_v5 }
 0x355   :  { %v633_v6 = vpop.eup %632 }
 0x356   :  { %v466_v7 = vadd.f32 %v633_v6, %v326_v33 }
 0x358   :  { %467 = vst [vmem:[#allocation7] sm:$0xff] %v466_v7 }
 0x359   :  { %689 = shalt.err (!%p686_p6)
}
 0x35a   :  { %s690_s20 = scalar_lea.hbm %s841_s4, 128 }
 0x35b   :  { %p691_p7 = scmp.ne.s32.totalorder %s841_s4, %s690_s20  ;;  %p694_p8 = scmp.lt.u32.totalorder %s690_s20, %s841_s4 }
 0x35d   :  { %p696_p9 = pnand %p694_p8, %p691_p7 }
 0x35f   :  { %699 = shalt.err (!%p696_p9)
}
 0x360   :  { %477 = dma.vmem_to_hbm [thread:$0]  %s475_s3, 128, %s841_s4, [#allocation4]  }
 0x361   :  { %704 = dma.done.wait [#allocation4], 128  }
 0x362   :  { %705 = vsyncadd [#allocation4], 4294967168 }
 0x363   :  { %481 = vsyncpa [#allocation3], 1 }
 0x364   :  { %482 = vsyncpa [#allocation6], 1 }
 0x365   :  { %483 = vsyncpa [#allocation4], 1 }

</bundles_post_ra>
